<compile_context>
chip_gen: v7x
topology: tpu7x:2x2x1
jax: 0.10.0
libtpu: 0.0.40
codegen_flags: <defaults>
</compile_context>

<pallas_src>
import jax
import jax.numpy as jnp
from jax.experimental import pallas as pl
from jax.experimental.pallas import tpu as pltpu

# ---------------------------------------------------------------- config ----
BATCH = 16
INPUT_DIM = 16
D_MODEL = 32
NHEAD = 4
NUM_LAYERS = 3
DIM_FF = 64
NUM_CLASSES = 2
OUT_PAD = 8          # classifier padded to 8 lanes (== full array last dim, legal
                     # BlockSpec; 16x less HBM writeback than a 128-lane pad)
MAX_TILE_N = 512     # rows per grid step; >=256 fills the 256-tall v6e/v7x MXU,
                     # 512 reaches ~85% of HBM roofline in measured Pallas data
MIN_SPLIT_N = 512    # split into >=2 "parallel" steps (v7x dual-TC) only when
                     # there is at least this much work (else step overhead wins)
LN_EPS = 1e-5


# ---------------------------------------------------------------- kernel ----
def tabpfn_kernel(x_ref, wemb_ref, bemb_ref, wvo_ref, w1_ref, b1_ref, w2_ref,
                  vec_ref, wc_ref, bc_ref, out_ref):
    """One grid step pushes a (TILE_N, .) slab of rows through the whole net."""

    def layer_norm(h, gamma=None, beta=None):
        # f32 stats, biased variance (matches torch.nn.LayerNorm)
        mu = jnp.mean(h, axis=-1, keepdims=True)
        var = jnp.mean((h - mu) ** 2, axis=-1, keepdims=True)
        hn = (h - mu) * jax.lax.rsqrt(var + LN_EPS)
        return hn if gamma is None else hn * gamma + beta

    def mm(a_f32, w_bf16):
        # bf16 operands on the MXU, f32 accumulation
        return jnp.dot(a_f32.astype(jnp.bfloat16), w_bf16,
                       preferred_element_type=jnp.float32)

    # input embedding: (TILE_N, INPUT_DIM) @ (INPUT_DIM, D_MODEL)
    h = mm(x_ref[...], wemb_ref[...]) + bemb_ref[...]

    num_layers = wvo_ref.shape[0]
    for l in range(num_layers):
        vec = vec_ref[l]                       # (6, D) packed biases / LN affines
        b_vo, b2 = vec[0:1], vec[1:2]
        g1, be1 = vec[2:3], vec[3:4]

        # --- self-attention + residual --------------------------------------
        # seq_len == 1 => attn_output == out_proj(V).  Wv@Wo and the residual
        # are pre-fused offline: wvo = I + Wv@Wo (kept f32 so the identity /
        # residual path keeps full activation precision; MXU has huge slack).
        h = layer_norm(
            jnp.dot(h, wvo_ref[l], preferred_element_type=jnp.float32) + b_vo,
            g1, be1)

        # --- feed-forward + residual -----------------------------------------
        ff = jnp.maximum(mm(h, w1_ref[l]) + b1_ref[l], 0.0)
        ff = mm(ff, w2_ref[l]) + b2
        if l == num_layers - 1:
            # last layer's LN2 affine is folded into the classifier offline
            h = layer_norm(h + ff)
        else:
            h = layer_norm(h + ff, vec[4:5], vec[5:6])

    # classifier head (f32 weights: tiny at D=32, keeps logits tight)
    out_ref[...] = (jnp.dot(h, wc_ref[...], preferred_element_type=jnp.float32)
                    + bc_ref[...])


# --------------------------------------------------------------- wrapper ----
def _full_spec(arr):
    """BlockSpec covering the whole (replicated) weight array."""
    nd = arr.ndim
    return pl.BlockSpec(arr.shape, lambda i, _nd=nd: (0,) * _nd)


def _choose_tiling(n):
    """Pick (tile_n, n_pad).

    * Small batches: one grid step covering everything (just 8-row alignment).
    * Large batches: tiles <= MAX_TILE_N, and at least 2 grid steps so the
      "parallel" axis shards across both TensorCores on v7x (no effect on
      single-TC v5e/v6e).  Step count is chosen to minimize row padding so we
      avoid materializing a large padded copy of x.
    """
    n8 = ((n + 7) // 8) * 8
    if n8 < MIN_SPLIT_N:
        return n8, n8
    steps = max(2, -(-n8 // MAX_TILE_N))
    tile = ((-(-n8 // steps) + 7) // 8) * 8
    return tile, steps * tile


def fuse_params(params):
    """Offline weight preparation (runs once, outside the kernel).

    Exact because seq_len == 1 makes attention == out_proj(V).  Must be
    regenerated whenever the raw weights change.
    """
    L, D, C = NUM_LAYERS, D_MODEL, NUM_CLASSES
    eye = jnp.eye(D, dtype=jnp.float32)
    # attention == out_proj(V); fold Wv@Wo AND the residual: wvo = I + Wv@Wo
    wvo = eye[None, :, :] + jnp.einsum("lij,ljk->lik", params["wv"], params["wo"])
    bvo = jnp.einsum("lij,ljk->lik", params["bv"], params["wo"]) + params["bo"]
    # fold the last layer's LN2 affine (g2, be2) into the classifier (exact, f32)
    g2_l, be2_l = params["g2"][L - 1], params["be2"][L - 1]           # (1, D)
    wc = params["wc"] * g2_l[0][:, None]                              # (D, C)
    bc = be2_l @ params["wc"] + params["bc"]                          # (1, C)
    # pack per-layer D-wide vectors into one slab: [b_vo, b2, g1, be1, g2, be2]
    # (the last layer's g2/be2 slots exist but are unused by the kernel)
    vec = jnp.concatenate([bvo, params["b2"], params["g1"], params["be1"],
                           params["g2"], params["be2"]], axis=1)      # (L, 6, D)
    # classifier zero-padded to OUT_PAD lanes (wrapper slices back)
    wc_p = jnp.zeros((D, OUT_PAD), jnp.float32).at[:, :C].set(wc)
    bc_p = jnp.zeros((1, OUT_PAD), jnp.float32).at[:, :C].set(bc)
    return {
        "wemb": params["wemb"].astype(jnp.bfloat16),
        "bemb": params["bemb"],
        "wvo": wvo,                                   # f32 (residual path)
        "w1": params["w1"].astype(jnp.bfloat16),
        "b1": params["b1"],
        "w2": params["w2"].astype(jnp.bfloat16),
        "vec": vec,
        "wc": wc_p,                                   # f32
        "bc": bc_p,
    }


@jax.jit
def tabpfn_forward(x, fused):
    n = x.shape[0]
    tile_n, n_pad = _choose_tiling(n)
    if n_pad != n:
        # TODO(synk): for huge ragged batches, run the tail as a second small
        # call instead of materializing a padded copy of x in HBM.
        x = jnp.pad(x, ((0, n_pad - n), (0, 0)))

    weight_order = ["wemb", "bemb", "wvo", "w1", "b1", "w2", "vec", "wc", "bc"]
    weights = [fused[k] for k in weight_order]

    out = pl.pallas_call(
        tabpfn_kernel,
        out_shape=jax.ShapeDtypeStruct((n_pad, OUT_PAD), jnp.float32),
        grid_spec=pltpu.PrefetchScalarGridSpec(
            num_scalar_prefetch=0,
            grid=(n_pad // tile_n,),
            in_specs=[pl.BlockSpec((tile_n, INPUT_DIM), lambda i: (i, 0))]
                     + [_full_spec(w) for w in weights],
            out_specs=pl.BlockSpec((tile_n, OUT_PAD), lambda i: (i, 0)),
        ),
        compiler_params=pltpu.CompilerParams(
            dimension_semantics=("parallel",)),
    )(x, *weights)
    return out[:n, :NUM_CLASSES]


# ---------------------------------------------------------- pure-JAX ref ----
def ref_forward(x, params):
    """Reference with the *full* multi-head attention math (Q, K, softmax), f32."""
    n = x.shape[0]
    dh = D_MODEL // NHEAD

    def layer_norm(h, gamma, beta):
        mu = jnp.mean(h, axis=-1, keepdims=True)
        var = jnp.mean((h - mu) ** 2, axis=-1, keepdims=True)
        return (h - mu) / jnp.sqrt(var + LN_EPS) * gamma + beta

    h = x @ params["wemb"] + params["bemb"]
    for l in range(NUM_LAYERS):
        q = h @ params["wq"][l] + params["bq"][l]
        k = h @ params["wk"][l] + params["bk"][l]
        v = h @ params["wv"][l] + params["bv"][l]
        qh = q.reshape(n, NHEAD, dh)
        kh = k.reshape(n, NHEAD, dh)
        vh = v.reshape(n, NHEAD, dh)
        # seq_len == 1: scores are (n, NHEAD, 1); softmax over the key axis -> 1
        scores = jnp.einsum("nhd,nhd->nh", qh, kh)[..., None] / jnp.sqrt(dh)
        weights = jax.nn.softmax(scores, axis=-1)
        attn = (weights * vh).reshape(n, D_MODEL)
        attn = attn @ params["wo"][l] + params["bo"][l]
        h = layer_norm(h + attn, params["g1"][l], params["be1"][l])
        ff = jax.nn.relu(h @ params["w1"][l] + params["b1"][l])
        ff = ff @ params["w2"][l] + params["b2"][l]
        h = layer_norm(h + ff, params["g2"][l], params["be2"][l])
    return h @ params["wc"] + params["bc"]


# ----------------------------------------------------------------- setup ----
def make_params(key):
    keys = iter(jax.random.split(key, 64))

    def nrm(shape, scale=0.05):
        return scale * jax.random.normal(next(keys), shape, dtype=jnp.float32)

    L, D, F, C = NUM_LAYERS, D_MODEL, DIM_FF, NUM_CLASSES
    params = {
        "wemb": nrm((INPUT_DIM, D)), "bemb": nrm((1, D)),
        "wq": nrm((L, D, D)), "bq": nrm((L, 1, D)),
        "wk": nrm((L, D, D)), "bk": nrm((L, 1, D)),
        "wv": nrm((L, D, D)), "bv": nrm((L, 1, D)),
        "wo": nrm((L, D, D)), "bo": nrm((L, 1, D)),
        "w1": nrm((L, D, F)), "b1": nrm((L, 1, F)),
        "w2": nrm((L, F, D)), "b2": nrm((L, 1, D)),
        "g1": 1.0 + nrm((L, 1, D)), "be1": nrm((L, 1, D)),
        "g2": 1.0 + nrm((L, 1, D)), "be2": nrm((L, 1, D)),
        "wc": nrm((D, C)), "bc": nrm((1, C)),
    }
    return params


if __name__ == "__main__":
    key = jax.random.PRNGKey(0)
    k_par, k_x = jax.random.split(key)
    params = make_params(k_par)
    fused = fuse_params(params)
    x = jax.random.normal(k_x, (BATCH, INPUT_DIM), dtype=jnp.float32)

    logits = jax.block_until_ready(tabpfn_forward(x, fused))

    expected = ref_forward(x, params)
    # bf16 hidden-layer matmul operands (f32 accumulation) -> loosened tolerance
    if not jnp.allclose(logits, expected, atol=2e-2, rtol=2e-2):
        max_err = float(jnp.max(jnp.abs(logits - expected)))
        raise AssertionError(f"Pallas kernel mismatch, max abs err {max_err}")

    print("KERNEL_OK")
</pallas_src>

<mosaic_0001>
module attributes {stable_mosaic.version = 11 : i64} {
  func.func @tabpfn_kernel(%arg0: i32, %arg1: memref<16x16xf32, #tpu.memory_space<vmem>>, %arg2: memref<16x32xbf16, #tpu.memory_space<vmem>>, %arg3: memref<1x32xf32, #tpu.memory_space<vmem>>, %arg4: memref<3x32x32xf32, #tpu.memory_space<vmem>>, %arg5: memref<3x32x64xbf16, #tpu.memory_space<vmem>>, %arg6: memref<3x1x64xf32, #tpu.memory_space<vmem>>, %arg7: memref<3x64x32xbf16, #tpu.memory_space<vmem>>, %arg8: memref<3x6x32xf32, #tpu.memory_space<vmem>>, %arg9: memref<32x8xf32, #tpu.memory_space<vmem>>, %arg10: memref<1x8xf32, #tpu.memory_space<vmem>>, %arg11: memref<16x8xf32, #tpu.memory_space<vmem>>) attributes {dimension_semantics = [#tpu.dimension_semantics<parallel>], iteration_bounds = array<i64: 1>, scalar_prefetch = 0 : i64, scratch_operands = 0 : i64, tpu.core_type = #tpu.core_type<tc>, window_params = [{transform_indices = @transform_0, window_bounds = array<i64: 16, 16>}, {pipeline_mode = #tpu.pipeline_mode<synchronous>, transform_indices = @transform_1, window_bounds = array<i64: 16, 32>}, {pipeline_mode = #tpu.pipeline_mode<synchronous>, transform_indices = @transform_2, window_bounds = array<i64: 1, 32>}, {pipeline_mode = #tpu.pipeline_mode<synchronous>, transform_indices = @transform_3, window_bounds = array<i64: 3, 32, 32>}, {pipeline_mode = #tpu.pipeline_mode<synchronous>, transform_indices = @transform_4, window_bounds = array<i64: 3, 32, 64>}, {pipeline_mode = #tpu.pipeline_mode<synchronous>, transform_indices = @transform_5, window_bounds = array<i64: 3, 1, 64>}, {pipeline_mode = #tpu.pipeline_mode<synchronous>, transform_indices = @transform_6, window_bounds = array<i64: 3, 64, 32>}, {pipeline_mode = #tpu.pipeline_mode<synchronous>, transform_indices = @transform_7, window_bounds = array<i64: 3, 6, 32>}, {pipeline_mode = #tpu.pipeline_mode<synchronous>, transform_indices = @transform_8, window_bounds = array<i64: 32, 8>}, {pipeline_mode = #tpu.pipeline_mode<synchronous>, transform_indices = @transform_9, window_bounds = array<i64: 1, 8>}, {transform_indices = @transform_10, window_bounds = array<i64: 16, 8>}]} {
    %c0 = arith.constant 0 : index
    %c0_0 = arith.constant 0 : index
    %0 = vector.load %arg1[%c0, %c0_0] : memref<16x16xf32, #tpu.memory_space<vmem>>, vector<16x16xf32>
    %c0_1 = arith.constant 0 : index
    %c0_2 = arith.constant 0 : index
    %1 = vector.load %arg2[%c0_1, %c0_2] : memref<16x32xbf16, #tpu.memory_space<vmem>>, vector<16x32xbf16>
    %2 = arith.truncf %0 : vector<16x16xf32> to vector<16x16xbf16>
    %cst = arith.constant dense<0.000000e+00> : vector<16x32xf32>
    %3 = tpu.matmul %2, %1, %cst {dimension_numbers = #tpu.dot_dimension_numbers<[1], [0], [0], [1], [0, 0, 1, 1], [], []>} : vector<16x16xbf16>, vector<16x32xbf16>, vector<16x32xf32> -> vector<16x32xf32>
    %c0_3 = arith.constant 0 : index
    %c0_4 = arith.constant 0 : index
    %4 = vector.load %arg3[%c0_3, %c0_4] : memref<1x32xf32, #tpu.memory_space<vmem>>, vector<1x32xf32>
    %5 = vector.broadcast %4 : vector<1x32xf32> to vector<16x32xf32>
    %6 = arith.addf %3, %5 : vector<16x32xf32>
    %c0_5 = arith.constant 0 : index
    %c0_6 = arith.constant 0 : index
    %c0_7 = arith.constant 0 : index
    %7 = vector.load %arg8[%c0_5, %c0_6, %c0_7] : memref<3x6x32xf32, #tpu.memory_space<vmem>>, vector<1x6x32xf32>
    %8 = vector.shape_cast %7 : vector<1x6x32xf32> to vector<6x32xf32>
    %9 = vector.extract_strided_slice %8 {offsets = [0, 0], sizes = [1, 32], strides = [1, 1]} : vector<6x32xf32> to vector<1x32xf32>
    %10 = vector.extract_strided_slice %8 {offsets = [1, 0], sizes = [1, 32], strides = [1, 1]} : vector<6x32xf32> to vector<1x32xf32>
    %11 = vector.extract_strided_slice %8 {offsets = [2, 0], sizes = [1, 32], strides = [1, 1]} : vector<6x32xf32> to vector<1x32xf32>
    %12 = vector.extract_strided_slice %8 {offsets = [3, 0], sizes = [1, 32], strides = [1, 1]} : vector<6x32xf32> to vector<1x32xf32>
    %c0_8 = arith.constant 0 : index
    %c0_9 = arith.constant 0 : index
    %c0_10 = arith.constant 0 : index
    %13 = vector.load %arg4[%c0_8, %c0_9, %c0_10] : memref<3x32x32xf32, #tpu.memory_space<vmem>>, vector<1x32x32xf32>
    %14 = vector.shape_cast %13 : vector<1x32x32xf32> to vector<32x32xf32>
    %cst_11 = arith.constant dense<0.000000e+00> : vector<16x32xf32>
    %15 = tpu.matmul %6, %14, %cst_11 {dimension_numbers = #tpu.dot_dimension_numbers<[1], [0], [0], [1], [0, 0, 1, 1], [], []>} : vector<16x32xf32>, vector<32x32xf32>, vector<16x32xf32> -> vector<16x32xf32>
    %16 = vector.broadcast %9 : vector<1x32xf32> to vector<16x32xf32>
    %17 = arith.addf %15, %16 : vector<16x32xf32>
    %cst_12 = arith.constant dense<0.000000e+00> : vector<16xf32>
    %18 = vector.multi_reduction <add>, %17, %cst_12 [1] : vector<16x32xf32> to vector<16xf32>
    %19 = vector.shape_cast %18 : vector<16xf32> to vector<16x1xf32>
    %cst_13 = arith.constant 3.200000e+01 : f32
    %20 = vector.broadcast %cst_13 : f32 to vector<16x1xf32>
    %21 = arith.divf %19, %20 : vector<16x1xf32>
    %22 = vector.broadcast %21 : vector<16x1xf32> to vector<16x32xf32>
    %23 = arith.subf %17, %22 : vector<16x32xf32>
    %24 = arith.mulf %23, %23 : vector<16x32xf32>
    %cst_14 = arith.constant dense<0.000000e+00> : vector<16xf32>
    %25 = vector.multi_reduction <add>, %24, %cst_14 [1] : vector<16x32xf32> to vector<16xf32>
    %26 = vector.shape_cast %25 : vector<16xf32> to vector<16x1xf32>
    %cst_15 = arith.constant 3.200000e+01 : f32
    %27 = vector.broadcast %cst_15 : f32 to vector<16x1xf32>
    %28 = arith.divf %26, %27 : vector<16x1xf32>
    %29 = vector.broadcast %21 : vector<16x1xf32> to vector<16x32xf32>
    %30 = arith.subf %17, %29 : vector<16x32xf32>
    %cst_16 = arith.constant 9.99999974E-6 : f32
    %31 = vector.broadcast %cst_16 : f32 to vector<16x1xf32>
    %32 = arith.addf %28, %31 : vector<16x1xf32>
    %33 = math.rsqrt %32 : vector<16x1xf32>
    %34 = vector.broadcast %33 : vector<16x1xf32> to vector<16x32xf32>
    %35 = arith.mulf %30, %34 : vector<16x32xf32>
    %36 = vector.broadcast %11 : vector<1x32xf32> to vector<16x32xf32>
    %37 = arith.mulf %35, %36 : vector<16x32xf32>
    %38 = vector.broadcast %12 : vector<1x32xf32> to vector<16x32xf32>
    %39 = arith.addf %37, %38 : vector<16x32xf32>
    %c0_17 = arith.constant 0 : index
    %c0_18 = arith.constant 0 : index
    %c0_19 = arith.constant 0 : index
    %40 = vector.load %arg5[%c0_17, %c0_18, %c0_19] : memref<3x32x64xbf16, #tpu.memory_space<vmem>>, vector<1x32x64xbf16>
    %41 = vector.shape_cast %40 : vector<1x32x64xbf16> to vector<32x64xbf16>
    %42 = arith.truncf %39 : vector<16x32xf32> to vector<16x32xbf16>
    %cst_20 = arith.constant dense<0.000000e+00> : vector<16x64xf32>
    %43 = tpu.matmul %42, %41, %cst_20 {dimension_numbers = #tpu.dot_dimension_numbers<[1], [0], [0], [1], [0, 0, 1, 1], [], []>} : vector<16x32xbf16>, vector<32x64xbf16>, vector<16x64xf32> -> vector<16x64xf32>
    %c0_21 = arith.constant 0 : index
    %c0_22 = arith.constant 0 : index
    %c0_23 = arith.constant 0 : index
    %44 = vector.load %arg6[%c0_21, %c0_22, %c0_23] : memref<3x1x64xf32, #tpu.memory_space<vmem>>, vector<1x1x64xf32>
    %45 = vector.shape_cast %44 : vector<1x1x64xf32> to vector<1x64xf32>
    %46 = vector.broadcast %45 : vector<1x64xf32> to vector<16x64xf32>
    %47 = arith.addf %43, %46 : vector<16x64xf32>
    %cst_24 = arith.constant 0.000000e+00 : f32
    %48 = vector.broadcast %cst_24 : f32 to vector<16x64xf32>
    %49 = arith.maximumf %47, %48 : vector<16x64xf32>
    %c0_25 = arith.constant 0 : index
    %c0_26 = arith.constant 0 : index
    %c0_27 = arith.constant 0 : index
    %50 = vector.load %arg7[%c0_25, %c0_26, %c0_27] : memref<3x64x32xbf16, #tpu.memory_space<vmem>>, vector<1x64x32xbf16>
    %51 = vector.shape_cast %50 : vector<1x64x32xbf16> to vector<64x32xbf16>
    %52 = arith.truncf %49 : vector<16x64xf32> to vector<16x64xbf16>
    %cst_28 = arith.constant dense<0.000000e+00> : vector<16x32xf32>
    %53 = tpu.matmul %52, %51, %cst_28 {dimension_numbers = #tpu.dot_dimension_numbers<[1], [0], [0], [1], [0, 0, 1, 1], [], []>} : vector<16x64xbf16>, vector<64x32xbf16>, vector<16x32xf32> -> vector<16x32xf32>
    %54 = vector.broadcast %10 : vector<1x32xf32> to vector<16x32xf32>
    %55 = arith.addf %53, %54 : vector<16x32xf32>
    %56 = arith.addf %39, %55 : vector<16x32xf32>
    %57 = vector.extract_strided_slice %8 {offsets = [4, 0], sizes = [1, 32], strides = [1, 1]} : vector<6x32xf32> to vector<1x32xf32>
    %58 = vector.extract_strided_slice %8 {offsets = [5, 0], sizes = [1, 32], strides = [1, 1]} : vector<6x32xf32> to vector<1x32xf32>
    %cst_29 = arith.constant dense<0.000000e+00> : vector<16xf32>
    %59 = vector.multi_reduction <add>, %56, %cst_29 [1] : vector<16x32xf32> to vector<16xf32>
    %60 = vector.shape_cast %59 : vector<16xf32> to vector<16x1xf32>
    %cst_30 = arith.constant 3.200000e+01 : f32
    %61 = vector.broadcast %cst_30 : f32 to vector<16x1xf32>
    %62 = arith.divf %60, %61 : vector<16x1xf32>
    %63 = vector.broadcast %62 : vector<16x1xf32> to vector<16x32xf32>
    %64 = arith.subf %56, %63 : vector<16x32xf32>
    %65 = arith.mulf %64, %64 : vector<16x32xf32>
    %cst_31 = arith.constant dense<0.000000e+00> : vector<16xf32>
    %66 = vector.multi_reduction <add>, %65, %cst_31 [1] : vector<16x32xf32> to vector<16xf32>
    %67 = vector.shape_cast %66 : vector<16xf32> to vector<16x1xf32>
    %cst_32 = arith.constant 3.200000e+01 : f32
    %68 = vector.broadcast %cst_32 : f32 to vector<16x1xf32>
    %69 = arith.divf %67, %68 : vector<16x1xf32>
    %70 = vector.broadcast %62 : vector<16x1xf32> to vector<16x32xf32>
    %71 = arith.subf %56, %70 : vector<16x32xf32>
    %cst_33 = arith.constant 9.99999974E-6 : f32
    %72 = vector.broadcast %cst_33 : f32 to vector<16x1xf32>
    %73 = arith.addf %69, %72 : vector<16x1xf32>
    %74 = math.rsqrt %73 : vector<16x1xf32>
    %75 = vector.broadcast %74 : vector<16x1xf32> to vector<16x32xf32>
    %76 = arith.mulf %71, %75 : vector<16x32xf32>
    %77 = vector.broadcast %57 : vector<1x32xf32> to vector<16x32xf32>
    %78 = arith.mulf %76, %77 : vector<16x32xf32>
    %79 = vector.broadcast %58 : vector<1x32xf32> to vector<16x32xf32>
    %80 = arith.addf %78, %79 : vector<16x32xf32>
    %c1 = arith.constant 1 : index
    %c0_34 = arith.constant 0 : index
    %c0_35 = arith.constant 0 : index
    %81 = vector.load %arg8[%c1, %c0_34, %c0_35] : memref<3x6x32xf32, #tpu.memory_space<vmem>>, vector<1x6x32xf32>
    %82 = vector.shape_cast %81 : vector<1x6x32xf32> to vector<6x32xf32>
    %83 = vector.extract_strided_slice %82 {offsets = [0, 0], sizes = [1, 32], strides = [1, 1]} : vector<6x32xf32> to vector<1x32xf32>
    %84 = vector.extract_strided_slice %82 {offsets = [1, 0], sizes = [1, 32], strides = [1, 1]} : vector<6x32xf32> to vector<1x32xf32>
    %85 = vector.extract_strided_slice %82 {offsets = [2, 0], sizes = [1, 32], strides = [1, 1]} : vector<6x32xf32> to vector<1x32xf32>
    %86 = vector.extract_strided_slice %82 {offsets = [3, 0], sizes = [1, 32], strides = [1, 1]} : vector<6x32xf32> to vector<1x32xf32>
    %c1_36 = arith.constant 1 : index
    %c0_37 = arith.constant 0 : index
    %c0_38 = arith.constant 0 : index
    %87 = vector.load %arg4[%c1_36, %c0_37, %c0_38] : memref<3x32x32xf32, #tpu.memory_space<vmem>>, vector<1x32x32xf32>
    %88 = vector.shape_cast %87 : vector<1x32x32xf32> to vector<32x32xf32>
    %cst_39 = arith.constant dense<0.000000e+00> : vector<16x32xf32>
    %89 = tpu.matmul %80, %88, %cst_39 {dimension_numbers = #tpu.dot_dimension_numbers<[1], [0], [0], [1], [0, 0, 1, 1], [], []>} : vector<16x32xf32>, vector<32x32xf32>, vector<16x32xf32> -> vector<16x32xf32>
    %90 = vector.broadcast %83 : vector<1x32xf32> to vector<16x32xf32>
    %91 = arith.addf %89, %90 : vector<16x32xf32>
    %cst_40 = arith.constant dense<0.000000e+00> : vector<16xf32>
    %92 = vector.multi_reduction <add>, %91, %cst_40 [1] : vector<16x32xf32> to vector<16xf32>
    %93 = vector.shape_cast %92 : vector<16xf32> to vector<16x1xf32>
    %cst_41 = arith.constant 3.200000e+01 : f32
    %94 = vector.broadcast %cst_41 : f32 to vector<16x1xf32>
    %95 = arith.divf %93, %94 : vector<16x1xf32>
    %96 = vector.broadcast %95 : vector<16x1xf32> to vector<16x32xf32>
    %97 = arith.subf %91, %96 : vector<16x32xf32>
    %98 = arith.mulf %97, %97 : vector<16x32xf32>
    %cst_42 = arith.constant dense<0.000000e+00> : vector<16xf32>
    %99 = vector.multi_reduction <add>, %98, %cst_42 [1] : vector<16x32xf32> to vector<16xf32>
    %100 = vector.shape_cast %99 : vector<16xf32> to vector<16x1xf32>
    %cst_43 = arith.constant 3.200000e+01 : f32
    %101 = vector.broadcast %cst_43 : f32 to vector<16x1xf32>
    %102 = arith.divf %100, %101 : vector<16x1xf32>
    %103 = vector.broadcast %95 : vector<16x1xf32> to vector<16x32xf32>
    %104 = arith.subf %91, %103 : vector<16x32xf32>
    %cst_44 = arith.constant 9.99999974E-6 : f32
    %105 = vector.broadcast %cst_44 : f32 to vector<16x1xf32>
    %106 = arith.addf %102, %105 : vector<16x1xf32>
    %107 = math.rsqrt %106 : vector<16x1xf32>
    %108 = vector.broadcast %107 : vector<16x1xf32> to vector<16x32xf32>
    %109 = arith.mulf %104, %108 : vector<16x32xf32>
    %110 = vector.broadcast %85 : vector<1x32xf32> to vector<16x32xf32>
    %111 = arith.mulf %109, %110 : vector<16x32xf32>
    %112 = vector.broadcast %86 : vector<1x32xf32> to vector<16x32xf32>
    %113 = arith.addf %111, %112 : vector<16x32xf32>
    %c1_45 = arith.constant 1 : index
    %c0_46 = arith.constant 0 : index
    %c0_47 = arith.constant 0 : index
    %114 = vector.load %arg5[%c1_45, %c0_46, %c0_47] : memref<3x32x64xbf16, #tpu.memory_space<vmem>>, vector<1x32x64xbf16>
    %115 = vector.shape_cast %114 : vector<1x32x64xbf16> to vector<32x64xbf16>
    %116 = arith.truncf %113 : vector<16x32xf32> to vector<16x32xbf16>
    %cst_48 = arith.constant dense<0.000000e+00> : vector<16x64xf32>
    %117 = tpu.matmul %116, %115, %cst_48 {dimension_numbers = #tpu.dot_dimension_numbers<[1], [0], [0], [1], [0, 0, 1, 1], [], []>} : vector<16x32xbf16>, vector<32x64xbf16>, vector<16x64xf32> -> vector<16x64xf32>
    %c1_49 = arith.constant 1 : index
    %c0_50 = arith.constant 0 : index
    %c0_51 = arith.constant 0 : index
    %118 = vector.load %arg6[%c1_49, %c0_50, %c0_51] : memref<3x1x64xf32, #tpu.memory_space<vmem>>, vector<1x1x64xf32>
    %119 = vector.shape_cast %118 : vector<1x1x64xf32> to vector<1x64xf32>
    %120 = vector.broadcast %119 : vector<1x64xf32> to vector<16x64xf32>
    %121 = arith.addf %117, %120 : vector<16x64xf32>
    %cst_52 = arith.constant 0.000000e+00 : f32
    %122 = vector.broadcast %cst_52 : f32 to vector<16x64xf32>
    %123 = arith.maximumf %121, %122 : vector<16x64xf32>
    %c1_53 = arith.constant 1 : index
    %c0_54 = arith.constant 0 : index
    %c0_55 = arith.constant 0 : index
    %124 = vector.load %arg7[%c1_53, %c0_54, %c0_55] : memref<3x64x32xbf16, #tpu.memory_space<vmem>>, vector<1x64x32xbf16>
    %125 = vector.shape_cast %124 : vector<1x64x32xbf16> to vector<64x32xbf16>
    %126 = arith.truncf %123 : vector<16x64xf32> to vector<16x64xbf16>
    %cst_56 = arith.constant dense<0.000000e+00> : vector<16x32xf32>
    %127 = tpu.matmul %126, %125, %cst_56 {dimension_numbers = #tpu.dot_dimension_numbers<[1], [0], [0], [1], [0, 0, 1, 1], [], []>} : vector<16x64xbf16>, vector<64x32xbf16>, vector<16x32xf32> -> vector<16x32xf32>
    %128 = vector.broadcast %84 : vector<1x32xf32> to vector<16x32xf32>
    %129 = arith.addf %127, %128 : vector<16x32xf32>
    %130 = arith.addf %113, %129 : vector<16x32xf32>
    %131 = vector.extract_strided_slice %82 {offsets = [4, 0], sizes = [1, 32], strides = [1, 1]} : vector<6x32xf32> to vector<1x32xf32>
    %132 = vector.extract_strided_slice %82 {offsets = [5, 0], sizes = [1, 32], strides = [1, 1]} : vector<6x32xf32> to vector<1x32xf32>
    %cst_57 = arith.constant dense<0.000000e+00> : vector<16xf32>
    %133 = vector.multi_reduction <add>, %130, %cst_57 [1] : vector<16x32xf32> to vector<16xf32>
    %134 = vector.shape_cast %133 : vector<16xf32> to vector<16x1xf32>
    %cst_58 = arith.constant 3.200000e+01 : f32
    %135 = vector.broadcast %cst_58 : f32 to vector<16x1xf32>
    %136 = arith.divf %134, %135 : vector<16x1xf32>
    %137 = vector.broadcast %136 : vector<16x1xf32> to vector<16x32xf32>
    %138 = arith.subf %130, %137 : vector<16x32xf32>
    %139 = arith.mulf %138, %138 : vector<16x32xf32>
    %cst_59 = arith.constant dense<0.000000e+00> : vector<16xf32>
    %140 = vector.multi_reduction <add>, %139, %cst_59 [1] : vector<16x32xf32> to vector<16xf32>
    %141 = vector.shape_cast %140 : vector<16xf32> to vector<16x1xf32>
    %cst_60 = arith.constant 3.200000e+01 : f32
    %142 = vector.broadcast %cst_60 : f32 to vector<16x1xf32>
    %143 = arith.divf %141, %142 : vector<16x1xf32>
    %144 = vector.broadcast %136 : vector<16x1xf32> to vector<16x32xf32>
    %145 = arith.subf %130, %144 : vector<16x32xf32>
    %cst_61 = arith.constant 9.99999974E-6 : f32
    %146 = vector.broadcast %cst_61 : f32 to vector<16x1xf32>
    %147 = arith.addf %143, %146 : vector<16x1xf32>
    %148 = math.rsqrt %147 : vector<16x1xf32>
    %149 = vector.broadcast %148 : vector<16x1xf32> to vector<16x32xf32>
    %150 = arith.mulf %145, %149 : vector<16x32xf32>
    %151 = vector.broadcast %131 : vector<1x32xf32> to vector<16x32xf32>
    %152 = arith.mulf %150, %151 : vector<16x32xf32>
    %153 = vector.broadcast %132 : vector<1x32xf32> to vector<16x32xf32>
    %154 = arith.addf %152, %153 : vector<16x32xf32>
    %c2 = arith.constant 2 : index
    %c0_62 = arith.constant 0 : index
    %c0_63 = arith.constant 0 : index
    %155 = vector.load %arg8[%c2, %c0_62, %c0_63] : memref<3x6x32xf32, #tpu.memory_space<vmem>>, vector<1x6x32xf32>
    %156 = vector.shape_cast %155 : vector<1x6x32xf32> to vector<6x32xf32>
    %157 = vector.extract_strided_slice %156 {offsets = [0, 0], sizes = [1, 32], strides = [1, 1]} : vector<6x32xf32> to vector<1x32xf32>
    %158 = vector.extract_strided_slice %156 {offsets = [1, 0], sizes = [1, 32], strides = [1, 1]} : vector<6x32xf32> to vector<1x32xf32>
    %159 = vector.extract_strided_slice %156 {offsets = [2, 0], sizes = [1, 32], strides = [1, 1]} : vector<6x32xf32> to vector<1x32xf32>
    %160 = vector.extract_strided_slice %156 {offsets = [3, 0], sizes = [1, 32], strides = [1, 1]} : vector<6x32xf32> to vector<1x32xf32>
    %c2_64 = arith.constant 2 : index
    %c0_65 = arith.constant 0 : index
    %c0_66 = arith.constant 0 : index
    %161 = vector.load %arg4[%c2_64, %c0_65, %c0_66] : memref<3x32x32xf32, #tpu.memory_space<vmem>>, vector<1x32x32xf32>
    %162 = vector.shape_cast %161 : vector<1x32x32xf32> to vector<32x32xf32>
    %cst_67 = arith.constant dense<0.000000e+00> : vector<16x32xf32>
    %163 = tpu.matmul %154, %162, %cst_67 {dimension_numbers = #tpu.dot_dimension_numbers<[1], [0], [0], [1], [0, 0, 1, 1], [], []>} : vector<16x32xf32>, vector<32x32xf32>, vector<16x32xf32> -> vector<16x32xf32>
    %164 = vector.broadcast %157 : vector<1x32xf32> to vector<16x32xf32>
    %165 = arith.addf %163, %164 : vector<16x32xf32>
    %cst_68 = arith.constant dense<0.000000e+00> : vector<16xf32>
    %166 = vector.multi_reduction <add>, %165, %cst_68 [1] : vector<16x32xf32> to vector<16xf32>
    %167 = vector.shape_cast %166 : vector<16xf32> to vector<16x1xf32>
    %cst_69 = arith.constant 3.200000e+01 : f32
    %168 = vector.broadcast %cst_69 : f32 to vector<16x1xf32>
    %169 = arith.divf %167, %168 : vector<16x1xf32>
    %170 = vector.broadcast %169 : vector<16x1xf32> to vector<16x32xf32>
    %171 = arith.subf %165, %170 : vector<16x32xf32>
    %172 = arith.mulf %171, %171 : vector<16x32xf32>
    %cst_70 = arith.constant dense<0.000000e+00> : vector<16xf32>
    %173 = vector.multi_reduction <add>, %172, %cst_70 [1] : vector<16x32xf32> to vector<16xf32>
    %174 = vector.shape_cast %173 : vector<16xf32> to vector<16x1xf32>
    %cst_71 = arith.constant 3.200000e+01 : f32
    %175 = vector.broadcast %cst_71 : f32 to vector<16x1xf32>
    %176 = arith.divf %174, %175 : vector<16x1xf32>
    %177 = vector.broadcast %169 : vector<16x1xf32> to vector<16x32xf32>
    %178 = arith.subf %165, %177 : vector<16x32xf32>
    %cst_72 = arith.constant 9.99999974E-6 : f32
    %179 = vector.broadcast %cst_72 : f32 to vector<16x1xf32>
    %180 = arith.addf %176, %179 : vector<16x1xf32>
    %181 = math.rsqrt %180 : vector<16x1xf32>
    %182 = vector.broadcast %181 : vector<16x1xf32> to vector<16x32xf32>
    %183 = arith.mulf %178, %182 : vector<16x32xf32>
    %184 = vector.broadcast %159 : vector<1x32xf32> to vector<16x32xf32>
    %185 = arith.mulf %183, %184 : vector<16x32xf32>
    %186 = vector.broadcast %160 : vector<1x32xf32> to vector<16x32xf32>
    %187 = arith.addf %185, %186 : vector<16x32xf32>
    %c2_73 = arith.constant 2 : index
    %c0_74 = arith.constant 0 : index
    %c0_75 = arith.constant 0 : index
    %188 = vector.load %arg5[%c2_73, %c0_74, %c0_75] : memref<3x32x64xbf16, #tpu.memory_space<vmem>>, vector<1x32x64xbf16>
    %189 = vector.shape_cast %188 : vector<1x32x64xbf16> to vector<32x64xbf16>
    %190 = arith.truncf %187 : vector<16x32xf32> to vector<16x32xbf16>
    %cst_76 = arith.constant dense<0.000000e+00> : vector<16x64xf32>
    %191 = tpu.matmul %190, %189, %cst_76 {dimension_numbers = #tpu.dot_dimension_numbers<[1], [0], [0], [1], [0, 0, 1, 1], [], []>} : vector<16x32xbf16>, vector<32x64xbf16>, vector<16x64xf32> -> vector<16x64xf32>
    %c2_77 = arith.constant 2 : index
    %c0_78 = arith.constant 0 : index
    %c0_79 = arith.constant 0 : index
    %192 = vector.load %arg6[%c2_77, %c0_78, %c0_79] : memref<3x1x64xf32, #tpu.memory_space<vmem>>, vector<1x1x64xf32>
    %193 = vector.shape_cast %192 : vector<1x1x64xf32> to vector<1x64xf32>
    %194 = vector.broadcast %193 : vector<1x64xf32> to vector<16x64xf32>
    %195 = arith.addf %191, %194 : vector<16x64xf32>
    %cst_80 = arith.constant 0.000000e+00 : f32
    %196 = vector.broadcast %cst_80 : f32 to vector<16x64xf32>
    %197 = arith.maximumf %195, %196 : vector<16x64xf32>
    %c2_81 = arith.constant 2 : index
    %c0_82 = arith.constant 0 : index
    %c0_83 = arith.constant 0 : index
    %198 = vector.load %arg7[%c2_81, %c0_82, %c0_83] : memref<3x64x32xbf16, #tpu.memory_space<vmem>>, vector<1x64x32xbf16>
    %199 = vector.shape_cast %198 : vector<1x64x32xbf16> to vector<64x32xbf16>
    %200 = arith.truncf %197 : vector<16x64xf32> to vector<16x64xbf16>
    %cst_84 = arith.constant dense<0.000000e+00> : vector<16x32xf32>
    %201 = tpu.matmul %200, %199, %cst_84 {dimension_numbers = #tpu.dot_dimension_numbers<[1], [0], [0], [1], [0, 0, 1, 1], [], []>} : vector<16x64xbf16>, vector<64x32xbf16>, vector<16x32xf32> -> vector<16x32xf32>
    %202 = vector.broadcast %158 : vector<1x32xf32> to vector<16x32xf32>
    %203 = arith.addf %201, %202 : vector<16x32xf32>
    %204 = arith.addf %187, %203 : vector<16x32xf32>
    %cst_85 = arith.constant dense<0.000000e+00> : vector<16xf32>
    %205 = vector.multi_reduction <add>, %204, %cst_85 [1] : vector<16x32xf32> to vector<16xf32>
    %206 = vector.shape_cast %205 : vector<16xf32> to vector<16x1xf32>
    %cst_86 = arith.constant 3.200000e+01 : f32
    %207 = vector.broadcast %cst_86 : f32 to vector<16x1xf32>
    %208 = arith.divf %206, %207 : vector<16x1xf32>
    %209 = vector.broadcast %208 : vector<16x1xf32> to vector<16x32xf32>
    %210 = arith.subf %204, %209 : vector<16x32xf32>
    %211 = arith.mulf %210, %210 : vector<16x32xf32>
    %cst_87 = arith.constant dense<0.000000e+00> : vector<16xf32>
    %212 = vector.multi_reduction <add>, %211, %cst_87 [1] : vector<16x32xf32> to vector<16xf32>
    %213 = vector.shape_cast %212 : vector<16xf32> to vector<16x1xf32>
    %cst_88 = arith.constant 3.200000e+01 : f32
    %214 = vector.broadcast %cst_88 : f32 to vector<16x1xf32>
    %215 = arith.divf %213, %214 : vector<16x1xf32>
    %216 = vector.broadcast %208 : vector<16x1xf32> to vector<16x32xf32>
    %217 = arith.subf %204, %216 : vector<16x32xf32>
    %cst_89 = arith.constant 9.99999974E-6 : f32
    %218 = vector.broadcast %cst_89 : f32 to vector<16x1xf32>
    %219 = arith.addf %215, %218 : vector<16x1xf32>
    %220 = math.rsqrt %219 : vector<16x1xf32>
    %221 = vector.broadcast %220 : vector<16x1xf32> to vector<16x32xf32>
    %222 = arith.mulf %217, %221 : vector<16x32xf32>
    %c0_90 = arith.constant 0 : index
    %c0_91 = arith.constant 0 : index
    %223 = vector.load %arg9[%c0_90, %c0_91] : memref<32x8xf32, #tpu.memory_space<vmem>>, vector<32x8xf32>
    %cst_92 = arith.constant dense<0.000000e+00> : vector<16x8xf32>
    %224 = tpu.matmul %222, %223, %cst_92 {dimension_numbers = #tpu.dot_dimension_numbers<[1], [0], [0], [1], [0, 0, 1, 1], [], []>} : vector<16x32xf32>, vector<32x8xf32>, vector<16x8xf32> -> vector<16x8xf32>
    %c0_93 = arith.constant 0 : index
    %c0_94 = arith.constant 0 : index
    %225 = vector.load %arg10[%c0_93, %c0_94] : memref<1x8xf32, #tpu.memory_space<vmem>>, vector<1x8xf32>
    %226 = vector.broadcast %225 : vector<1x8xf32> to vector<16x8xf32>
    %227 = arith.addf %224, %226 : vector<16x8xf32>
    %c0_95 = arith.constant 0 : index
    %c0_96 = arith.constant 0 : index
    %228 = vector.load %arg11[%c0_95, %c0_96] : memref<16x8xf32, #tpu.memory_space<vmem>>, vector<16x8xf32>
    tpu.vector_store %arg11[%c0_95, %c0_96], %227 {strides = array<i32>} : memref<16x8xf32, #tpu.memory_space<vmem>>, vector<16x8xf32>,
    return
  }
  func.func @transform_0(%arg0: i32) -> (i32, i32) {
    %c0_i32 = arith.constant 0 : i32
    %c0_i32_0 = arith.constant 0 : i32
    return %arg0, %c0_i32 : i32, i32
  }
  func.func @transform_1(%arg0: i32) -> (i32, i32) {
    %c0_i32 = arith.constant 0 : i32
    %c0_i32_0 = arith.constant 0 : i32
    %c0_i32_1 = arith.constant 0 : i32
    return %c0_i32, %c0_i32_0 : i32, i32
  }
  func.func @transform_2(%arg0: i32) -> (i32, i32) {
    %c0_i32 = arith.constant 0 : i32
    %c0_i32_0 = arith.constant 0 : i32
    %c0_i32_1 = arith.constant 0 : i32
    return %c0_i32, %c0_i32_0 : i32, i32
  }
  func.func @transform_3(%arg0: i32) -> (i32, i32, i32) {
    %c0_i32 = arith.constant 0 : i32
    %c0_i32_0 = arith.constant 0 : i32
    %c0_i32_1 = arith.constant 0 : i32
    %c0_i32_2 = arith.constant 0 : i32
    return %c0_i32, %c0_i32_0, %c0_i32_1 : i32, i32, i32
  }
  func.func @transform_4(%arg0: i32) -> (i32, i32, i32) {
    %c0_i32 = arith.constant 0 : i32
    %c0_i32_0 = arith.constant 0 : i32
    %c0_i32_1 = arith.constant 0 : i32
    %c0_i32_2 = arith.constant 0 : i32
    return %c0_i32, %c0_i32_0, %c0_i32_1 : i32, i32, i32
  }
  func.func @transform_5(%arg0: i32) -> (i32, i32, i32) {
    %c0_i32 = arith.constant 0 : i32
    %c0_i32_0 = arith.constant 0 : i32
    %c0_i32_1 = arith.constant 0 : i32
    %c0_i32_2 = arith.constant 0 : i32
    return %c0_i32, %c0_i32_0, %c0_i32_1 : i32, i32, i32
  }
  func.func @transform_6(%arg0: i32) -> (i32, i32, i32) {
    %c0_i32 = arith.constant 0 : i32
    %c0_i32_0 = arith.constant 0 : i32
    %c0_i32_1 = arith.constant 0 : i32
    %c0_i32_2 = arith.constant 0 : i32
    return %c0_i32, %c0_i32_0, %c0_i32_1 : i32, i32, i32
  }
  func.func @transform_7(%arg0: i32) -> (i32, i32, i32) {
    %c0_i32 = arith.constant 0 : i32
    %c0_i32_0 = arith.constant 0 : i32
    %c0_i32_1 = arith.constant 0 : i32
    %c0_i32_2 = arith.constant 0 : i32
    return %c0_i32, %c0_i32_0, %c0_i32_1 : i32, i32, i32
  }
  func.func @transform_8(%arg0: i32) -> (i32, i32) {
    %c0_i32 = arith.constant 0 : i32
    %c0_i32_0 = arith.constant 0 : i32
    %c0_i32_1 = arith.constant 0 : i32
    return %c0_i32, %c0_i32_0 : i32, i32
  }
  func.func @transform_9(%arg0: i32) -> (i32, i32) {
    %c0_i32 = arith.constant 0 : i32
    %c0_i32_0 = arith.constant 0 : i32
    %c0_i32_1 = arith.constant 0 : i32
    return %c0_i32, %c0_i32_0 : i32, i32
  }
  func.func @transform_10(%arg0: i32) -> (i32, i32) {
    %c0_i32 = arith.constant 0 : i32
    %c0_i32_0 = arith.constant 0 : i32
    return %arg0, %c0_i32 : i32, i32
  }
}

</mosaic_0001>

<bundles_post_ra>
// kernel: tabpfn_forward.1
= control target key start
LH: loop header
LB: loop body
LE: loop exit
PB: predicated region body
PF: predicated region fallthrough
CT: control target
= control target key end

     0   :  { %15 = vsyncpa [#allocation3], 0  ;;  %s1930_s0 = inlined_call_operand.hbm [shape: f32[16,16], index: 0, kind: input, shape index: {}]   ;;  %s1931_s1 = inlined_call_operand.vmem [shape: bf16[16,32], index: 1, kind: input, shape index: {}]   ;;  %s1932_s2 = inlined_call_operand.vmem [shape: f32[1,32], index: 2, kind: input, shape index: {}]   ;;  %s1933_s3 = inlined_call_operand.vmem [shape: f32[3,32,32], index: 3, kind: input, shape index: {}]   ;;  %s1934_s4 = inlined_call_operand.vmem [shape: bf16[3,32,64], index: 4, kind: input, shape index: {}]   ;;  %s1935_s5 = inlined_call_operand.hbm [shape: f32[3,1,64], index: 5, kind: input, shape index: {}]   ;;  %s1936_s6 = inlined_call_operand.vmem [shape: bf16[3,64,32], index: 6, kind: input, shape index: {}]   ;;  %s1937_s7 = inlined_call_operand.hbm [shape: f32[3,6,32], index: 7, kind: input, shape index: {}]   ;;  %s1938_s8 = inlined_call_operand.vmem [shape: f32[32,8], index: 8, kind: input, shape index: {}]   ;;  %s1939_s9 = inlined_call_operand.vmem [shape: f32[1,8], index: 9, kind: input, shape index: {}]   ;;  %s1940_s10 = inlined_call_operand.vmem [shape: f32[16,8], index: 10, kind: output, shape index: {}]  }
   0x1   :  { %16 = vsyncpa [#allocation5], 0  ;;  %s1584_s13 = smov [#allocation4]   ;;  %s1514_s17 = scalar_lea.hbm %s1935_s5, 48 }
   0x2   :  { %s42_s14 = sshll.u32 %s1584_s13, 4  ;;  %p1515_p0 = scmp.ne.s32.totalorder %s1935_s5, %s1514_s17  ;;  %s43_s14 = int_to_ptr.vmem [resolvable:$true] %s42_s14 }
   0x3   :  { %p1518_p1 = scmp.lt.u32.totalorder %s1514_s17, %s1935_s5 }
   0x5   :  { %p1520_p2 = pnand %p1518_p1, %p1515_p0 }
   0x7   :  { %1523 = shalt.err (!%p1520_p2)
}
   0x8   :  { %s1524_s22 = scalar_lea.vmem %s43_s14, 48  ;;  %s1528_s23 = scalar_lea.vmem %s43_s14, 64 }
   0x9   :  { %p1525_p3 = scmp.ne.s32.totalorder %s43_s14, %s1524_s22  ;;  %p1529_p4 = scmp.lt.s32.totalorder %s43_s14, %s43_s14 }
   0xa   :  { %p1530_p5 = scmp.lt.s32.totalorder %s1528_s23, %s1524_s22 }
   0xc   :  { %p1531_p6 = por %p1530_p5, %p1529_p4 }
   0xe   :  { %p1532_p7 = pnand %p1531_p6, %p1525_p3 }
  0x10   :  { %1535 = shalt.err (!%p1532_p7)
}
  0x11   :  { %s1585_s24 = smov 16   ;;  %s1586_s25 = smov 1  }
  0x12   :  { %48 = dma.hbm_to_vmem [thread:$0]  %s1935_s5, 48, %s43_s14, [#allocation5], %s1585_s24, %s1585_s24, %s1586_s25  }
  0x13   :  { %s1587_s28 = smov [#allocation2]   ;;  %s1536_s12 = scalar_lea.hbm %s1930_s0, 256 }
  0x14   :  { %s22_s29 = sshll.u32 %s1587_s28, 4  ;;  %p1537_p8 = scmp.ne.s32.totalorder %s1930_s0, %s1536_s12  ;;  %s23_s29 = int_to_ptr.vmem [resolvable:$true] %s22_s29 }
  0x15   :  { %p1540_p9 = scmp.lt.u32.totalorder %s1536_s12, %s1930_s0 }
  0x17   :  { %p1542_p10 = pnand %p1540_p9, %p1537_p8 }
  0x19   :  { %1545 = shalt.err (!%p1542_p10)
}
  0x1a   :  { %s1546_s18 = scalar_lea.vmem %s23_s29, 256  ;;  %p1551_p12 = scmp.lt.s32.totalorder %s23_s29, %s23_s29 }
  0x1b   :  { %p1547_p11 = scmp.ne.s32.totalorder %s23_s29, %s1546_s18  ;;  %p1552_p13 = scmp.lt.s32.totalorder %s1546_s18, %s1546_s18 }
  0x1d   :  { %p1553_p0 = por %p1552_p13, %p1551_p12 }
  0x1f   :  { %p1554_p1 = pnand %p1553_p0, %p1547_p11 }
  0x21   :  { %1557 = shalt.err (!%p1554_p1)
}
  0x22   :  { %s1588_s5 = smov 128   ;;  %s1589_s14 = smov 8  }
  0x23   :  { %28 = dma.hbm_to_vmem [thread:$0]  %s1930_s0, 256, %s23_s29, [#allocation3], %s1588_s5, %s1588_s5, %s1589_s14  }
  0x24   :  { %s1590_s21 = smov [#allocation6]   ;;  %s1558_s25 = scalar_lea.hbm %s1937_s7, 384 }
  0x25   :  { %s56_s22 = sshll.u32 %s1590_s21, 4  ;;  %p1559_p2 = scmp.ne.s32.totalorder %s1937_s7, %s1558_s25  ;;  %s57_s22 = int_to_ptr.vmem [resolvable:$true] %s56_s22 }
  0x26   :  { %p1562_p3 = scmp.lt.u32.totalorder %s1558_s25, %s1937_s7 }
  0x28   :  { %p1564_p4 = pnand %p1562_p3, %p1559_p2 }
  0x2a   :  { %1567 = shalt.err (!%p1564_p4)
}
  0x2b   :  { %s1568_s11 = scalar_lea.vmem %s57_s22, 384  ;;  %p1573_p6 = scmp.lt.s32.totalorder %s57_s22, %s57_s22 }
  0x2c   :  { %p1569_p5 = scmp.ne.s32.totalorder %s57_s22, %s1568_s11  ;;  %p1574_p7 = scmp.lt.s32.totalorder %s1568_s11, %s1568_s11 }
  0x2e   :  { %p1575_p8 = por %p1574_p7, %p1573_p6 }
  0x30   :  { %p1576_p9 = pnand %p1575_p8, %p1569_p5 }
  0x32   :  { %1579 = shalt.err (!%p1576_p9)
}
  0x33   :  { %62 = dma.hbm_to_vmem [thread:$0]  %s1937_s7, 384, %s57_s22, [#allocation5], %s1588_s5, %s1588_s5, %s1589_s14  }
  0x34   :  { %1580 = dma.done.wait [#allocation3], 256  }
  0x35   :  { %1581 = vsyncadd [#allocation3], 4294967040 }
  0x36   :  { %1582 = dma.done.wait [#allocation5], 432  }
  0x37   :  { %1583 = vsyncadd [#allocation5], 4294966864  ;;  %v1591_v0 = vmov 0.0   ;;  %vm1592_vm0 = vmmov 0   ;;  %v1471_v1 = vld [vmem:[%s1931_s1] sm:$0xff]   ;;  %v78_v3 = vld [vmem:[#allocation2 + $0x8] sm:$0xff]  ;;  %v145_v18 = vlaneseq }
  0x38   :  { %1320 = vmatprep.subr.bf16.mxu0 %v1591_v0  ;;  %1322 = vmatprep.mubr.msk.bf16.mxu0 %vm1592_vm0, %v1591_v0  ;;  %v77_v2 = vld [vmem:[#allocation2] sm:$0xff]  ;;  %vm95_vm1 = vcmask 130048   ;;  %v142_v6 = vld [vmem:[%s1933_s3 + $0x8] sm:$0xff]  ;;  %v143_v8 = vld [vmem:[%s1933_s3 + $0x10] sm:$0xff]  ;;  %vm149_vm2 = vcmask 261120   ;;  %vm377_vm3 = vcmask 523264  }
  0x39   :  { %v141_v4 = vld [vmem:[%s1933_s3] sm:$0xff]  ;;  %1321 = vmatpush3.bf16.msra.mxu0 %v1471_v1  ;;  %v81_v5 = vpack.c.bf16 %v78_v3, %v77_v2  ;;  %v144_v9 = vld [vmem:[%s1933_s3 + $0x18] sm:$0xff]  ;;  %v1713_v19 = vshrl.u32 %v145_v18, 7  ;;  %v1473_v40 = vld [vmem:[%s1934_s4 + $0x8] sm:$0xff]   ;;  %vm1190_vm4 = vcmask 64512  }
  0x3a   :  { %v1430_v7 = vpack.c.bf16 %v142_v6, %v141_v4  ;;  %1337 = vmatprep.subr.bf16.mxu0 %v1591_v0  ;;  %v1434_v10 = vpack.c.bf16 %v144_v9, %v143_v8  ;;  %v1199_v11 = vld [vmem:[%s1932_s2] ss:$0 sm:$0xff]  ;;  %v1718_v21 = vld [vmem:[#allocation6] sm:$0x3f]  ;;  %v1475_v42 = vld [vmem:[%s1936_s6 + $0x8] sm:$0xff]  }
  0x3b   :  { %v1716_v20 = vsub.s32 0, %v1713_v19  ;;  %v1472_v39 = vld [vmem:[%s1934_s4] sm:$0xff]   ;;  %v1742_v49 = vsub.s32 2, %v1713_v19  ;;  %v1747_v53 = vsub.s32 3, %v1713_v19  ;;  %v1476_v62 = vld [vmem:[%s1936_s6 + $0x10] sm:$0xff]   ;;  %v1477_v63 = vld [vmem:[%s1936_s6 + $0x18] sm:$0xff]  }
  0x3c   :  { %1323 = vmatmul.mubr.msk.bf16.vlgmr.msra.gmra.mrb[0].mxu0 %vm95_vm1, %v81_v5  ;;  %1431 = vmatprep.subr.bf16.mxu1 %v1430_v7  ;;  %v1474_v41 = vld [vmem:[%s1936_s6] sm:$0xff]   ;;  %v1204_v1 = vld [vmem:[#allocation4] ss:$0 sm:$0xff] }
  0x3d   :  { %1433 = vmatpush3.bf16.msra.mxu1 %v1430_v7  ;;  %1341 = vmatprep.mubr.msk.bf16.mxu0 %vm1592_vm0, %v1591_v0  ;;  %v148_v22 = vrot.slane %v1718_v21, %v1716_v20  ;;  %v261_v51 = vrot.slane %v1718_v21, %v1742_v49  ;;  %v267_v57 = vrot.slane %v1718_v21, %v1747_v53 }
  0x3e   :  { %1435 = vmatprep.subr.bf16.mxu1 %v1434_v10  ;;  %1338 = vmatpush3.bf16.msra.mxu0 %v1472_v39  ;;  %v1215_v39 = vld [vmem:[%s1933_s3 + $0x30] sm:$0xff] }
  0x3f   :  { %1339 = vmatprep.subr.bf16.mxu0 %v1591_v0 }
  0x41   :  { %1437 = vmatpush3.bf16.msra.mxu1 %v1434_v10 }
  0x42   :  { %1345 = vmatprep.subr.bf16.mxu1 %v1591_v0  ;;  %1340 = vmatpush3.bf16.msra.mxu0 %v1473_v40  ;;  %v1216_v40 = vld [vmem:[%s1933_s3 + $0x38] sm:$0xff] }
 0x10f   :  { %v133_v12 = vpop.f32.mrb[0].mxu0 }
 0x110   :  { %v134_v13 = vadd.f32 %v1199_v11, %v133_v12  ;;  %v1324_v14 = vpop.f32.mrb[1].mxu0 }
 0x111   :  { %v136_v15 = vpop.f32.mrb[2].mxu0 }
 0x112   :  { %v137_v16 = vadd.f32 %v1199_v11, %v136_v15  ;;  %v1325_v17 = vpop.f32.mrb[3].mxu0  ;;  %1334 = vmatprep.mubr.msk.f32.mxu1 %vm149_vm2, %v134_v13  ;;  %v1764_v11 = vsub.s32 1, %v1713_v19 }
 0x114   :  { %1335 = vmatmul.mubr.msk.f32.vlgmr.msra.gmra.mrb[0].mxu1 %vm149_vm2, %v137_v16  ;;  %v352_v12 = vrot.slane %v1718_v21, %v1764_v11 }
 0x115   :  { %1353 = vmatprep.mubr.msk.bf16.mxu1 %vm1592_vm0, %v1591_v0  ;;  %1346 = vmatpush3.bf16.msra.mxu1 %v1474_v41  ;;  %v1442_v41 = vpack.c.bf16 %v1216_v40, %v1215_v39 }
 0x116   :  { %1347 = vmatprep.subr.bf16.mxu1 %v1591_v0 }
 0x119   :  { %1348 = vmatpush3.bf16.msra.mxu1 %v1475_v42 }
 0x11a   :  { %1349 = vmatprep.subr.bf16.mxu1 %v1591_v0 }
 0x11d   :  { %1350 = vmatpush3.bf16.msra.mxu1 %v1476_v62  ;;  %v1797_v62 = vld [vmem:[#allocation6 + $0x8] sm:$0x3f] }
 0x11e   :  { %1351 = vmatprep.subr.bf16.mxu1 %v1591_v0 }
 0x121   :  { %1352 = vmatpush3.bf16.msra.mxu1 %v1477_v63  ;;  %v472_v63 = vrot.slane %v1797_v62, %v1716_v20 }
 0x122   :  { %1376 = vmatprep.subr.bf16.mxu1 %v1591_v0 }
 0x1e7   :  { %v1336_v23 = vpop.f32.mrb[0].mxu1 }
 0x1e8   :  { %v222_v24 = vpop.f32.mrb[1].mxu1  ;;  %v228_v26 = vadd.f32 %v1336_v23, %v148_v22 }
 0x1e9   :  { %v223_v25 = vadd.f32 %v222_v24, %v148_v22 }
 0x1ea   :  { %v234_v28 = vsel %vm149_vm2, %v228_v26, 0.0 }
 0x1eb   :  { %v231_v27 = vsel %vm149_vm2, %v223_v25, 0.0 }
 0x1ec   :  { %232 = vadd.xlane.f32.xlu0 %v231_v27 }
 0x1f0   :  { %235 = vadd.xlane.f32.xlu0 %v234_v28 }
 0x279   :  { %v233_v29 = vpop.xlane.xlu0 %232 }
 0x27a   :  { %v238_v30 = vmul.f32 0.03125, %v233_v29 }
 0x27c   :  { %v240_v31 = vsub.f32 %v223_v25, %v238_v30 }
 0x27d   :  { %v236_v32 = vpop.xlane.xlu0 %235 }
 0x27e   :  { %v239_v33 = vmul.f32 0.03125, %v236_v32  ;;  %v242_v34 = vmul.f32 %v240_v31, %v240_v31 }
 0x280   :  { %v241_v35 = vsub.f32 %v228_v26, %v239_v33  ;;  %v244_v36 = vsel %vm149_vm2, %v242_v34, 0.0 }
 0x281   :  { %245 = vadd.xlane.f32.xlu1 %v244_v36  ;;  %v1213_v36 = vld [vmem:[%s1933_s3 + $0x20] sm:$0xff] }
 0x282   :  { %v243_v37 = vmul.f32 %v241_v35, %v241_v35 }
 0x284   :  { %v247_v38 = vsel %vm149_vm2, %v243_v37, 0.0  ;;  %v1214_v37 = vld [vmem:[%s1933_s3 + $0x28] sm:$0xff] }
 0x285   :  { %248 = vadd.xlane.f32.xlu1 %v247_v38  ;;  %v1438_v38 = vpack.c.bf16 %v1214_v37, %v1213_v36 }
 0x287   :  { %1439 = vmatprep.subr.bf16.mxu0 %v1438_v38 }
 0x30e   :  { %v246_v43 = vpop.xlane.xlu1 %245 }
 0x30f   :  { %v250_v44 = vmul.f32 0.03125, %v246_v43 }
 0x311   :  { %v252_v45 = vadd.f32 1e-05, %v250_v44 }
 0x312   :  { %v249_v46 = vpop.xlane.xlu1 %248 }
 0x313   :  { %1490 = vrsqrt.f32 %v252_v45  ;;  %v251_v47 = vmul.f32 0.03125, %v249_v46 }
 0x315   :  { %v253_v48 = vadd.f32 1e-05, %v251_v47 }
 0x317   :  { %1492 = vrsqrt.f32 %v253_v48  ;;  %v452_v48 = vsub.s32 4, %v1713_v19 }
 0x31d   :  { %v1491_v50 = vpop.eup %1490 }
 0x31e   :  { %v256_v52 = vmul.f32 %v1491_v50, %v240_v31  ;;  %v458_v50 = vsub.s32 5, %v1713_v19 }
 0x320   :  { %v262_v55 = vmul.f32 %v261_v51, %v256_v52 }
 0x321   :  { %v1493_v54 = vpop.eup %1492 }
 0x322   :  { %v257_v56 = vmul.f32 %v1493_v54, %v241_v35  ;;  %v268_v59 = vadd.f32 %v267_v57, %v262_v55  ;;  %v459_v55 = vrot.slane %v1718_v21, %v458_v50 }
 0x324   :  { %v263_v58 = vmul.f32 %v261_v51, %v257_v56  ;;  %v453_v51 = vrot.slane %v1718_v21, %v452_v48 }
 0x326   :  { %v269_v60 = vadd.f32 %v267_v57, %v263_v58 }
 0x328   :  { %v274_v61 = vpack.c.bf16 %v269_v60, %v268_v59 }
 0x32a   :  { %1342 = vmatmul.mubr.msk.bf16.vlgmr.msra.gmra.mrb[4].mxu0 %vm149_vm2, %v274_v61 }
 0x32b   :  { %1441 = vmatpush3.bf16.msra.mxu0 %v1438_v38 }
 0x32c   :  { %1443 = vmatprep.subr.bf16.mxu0 %v1442_v41 }
 0x32f   :  { %1445 = vmatpush3.bf16.msra.mxu0 %v1442_v41  ;;  %v1482_v41 = vld [vmem:[%s1936_s6 + $0x30] sm:$0xff]  }
 0x330   :  { %1368 = vmatprep.subr.bf16.mxu0 %v1591_v0 }
 0x3fd   :  { %v331_v2 = vpop.f32.mrb[4].mxu0 }
 0x3fe   :  { %v332_v3 = vadd.f32 %v1204_v1, %v331_v2  ;;  %v1343_v4 = vpop.f32.mrb[5].mxu0 }
 0x3ff   :  { %v334_v5 = vpop.f32.mrb[6].mxu0 }
 0x400   :  { %v335_v6 = vadd.f32 %v1204_v1, %v334_v5  ;;  %v1344_v7 = vpop.f32.mrb[7].mxu0  ;;  %v338_v8 = vmax.f32 %v332_v3, 0.0 }
 0x402   :  { %v339_v9 = vmax.f32 %v335_v6, 0.0 }
 0x404   :  { %v348_v10 = vpack.c.bf16 %v339_v9, %v338_v8 }
 0x406   :  { %1354 = vmatmul.mubr.msk.bf16.vlgmr.msra.gmra.mrb[4].mxu1 %vm377_vm3, %v348_v10 }
 0x407   :  { %1384 = vmatprep.mubr.msk.bf16.mxu1 %vm1592_vm0, %v1591_v0 }
 0x4d9   :  { %v415_v13 = vpop.f32.mrb[4].mxu1 }
 0x4da   :  { %v416_v14 = vadd.f32 %v415_v13, %v352_v12  ;;  %v1355_v15 = vpop.f32.mrb[5].mxu1 }
 0x4db   :  { %v418_v16 = vpop.f32.mrb[6].mxu1 }
 0x4dc   :  { %v419_v17 = vadd.f32 %v418_v16, %v352_v12  ;;  %v1356_v18 = vpop.f32.mrb[7].mxu1  ;;  %v422_v22 = vadd.f32 %v416_v14, %v268_v59 }
 0x4dd   :  { %v1479_v18 = vld [vmem:[%s1934_s4 + $0x18] sm:$0xff]  }
 0x4de   :  { %v424_v23 = vsel %vm149_vm2, %v422_v22, 0.0  ;;  %v423_v24 = vadd.f32 %v419_v17, %v269_v60  ;;  %v1478_v17 = vld [vmem:[%s1934_s4 + $0x10] sm:$0xff]  }
 0x4df   :  { %425 = vadd.xlane.f32.xlu0 %v424_v23  ;;  %v1481_v23 = vld [vmem:[%s1936_s6 + $0x28] sm:$0xff]  }
 0x4e0   :  { %v427_v25 = vsel %vm149_vm2, %v423_v24, 0.0 }
 0x4e1   :  { %428 = vadd.xlane.f32.xlu1 %v427_v25 }
 0x56c   :  { %v426_v26 = vpop.xlane.xlu0 %425 }
 0x56d   :  { %v430_v27 = vmul.f32 0.03125, %v426_v26 }
 0x56e   :  { %v429_v28 = vpop.xlane.xlu1 %428 }
 0x56f   :  { %v432_v29 = vsub.f32 %v422_v22, %v430_v27  ;;  %v431_v30 = vmul.f32 0.03125, %v429_v28  ;;  %v1480_v22 = vld [vmem:[%s1936_s6 + $0x20] sm:$0xff]  }
 0x570   :  { %1377 = vmatpush3.bf16.msra.mxu1 %v1480_v22  ;;  %v1242_v22 = vld [vmem:[%s1933_s3 + $0x50] sm:$0xff] }
 0x571   :  { %v433_v31 = vsub.f32 %v423_v24, %v431_v30  ;;  %v434_v32 = vmul.f32 %v432_v29, %v432_v29  ;;  %1378 = vmatprep.subr.bf16.mxu1 %v1591_v0  ;;  %v583_v30 = vrot.slane %v1797_v62, %v1742_v49 }
 0x573   :  { %v436_v33 = vsel %vm149_vm2, %v434_v32, 0.0  ;;  %v435_v34 = vmul.f32 %v433_v31, %v433_v31 }
 0x574   :  { %437 = vadd.xlane.f32.xlu0 %v436_v33  ;;  %1379 = vmatpush3.bf16.msra.mxu1 %v1481_v23  ;;  %v1243_v23 = vld [vmem:[%s1933_s3 + $0x58] sm:$0xff] }
 0x575   :  { %v439_v35 = vsel %vm149_vm2, %v435_v34, 0.0  ;;  %1380 = vmatprep.subr.bf16.mxu1 %v1591_v0  ;;  %v589_v34 = vrot.slane %v1797_v62, %v1747_v53 }
 0x576   :  { %440 = vadd.xlane.f32.xlu1 %v439_v35 }
 0x578   :  { %1381 = vmatpush3.bf16.msra.mxu1 %v1482_v41 }
 0x579   :  { %1382 = vmatprep.subr.bf16.mxu1 %v1591_v0 }
 0x601   :  { %v438_v42 = vpop.xlane.xlu0 %437 }
 0x602   :  { %v442_v43 = vmul.f32 0.03125, %v438_v42  ;;  %v1483_v42 = vld [vmem:[%s1936_s6 + $0x38] sm:$0xff]  }
 0x603   :  { %v441_v44 = vpop.xlane.xlu1 %440  ;;  %1383 = vmatpush3.bf16.msra.mxu1 %v1483_v42 }
 0x604   :  { %v444_v45 = vadd.f32 1e-05, %v442_v43  ;;  %v443_v46 = vmul.f32 0.03125, %v441_v44  ;;  %1407 = vmatprep.subr.bf16.mxu1 %v1591_v0  ;;  %v1223_v43 = vld [vmem:[#allocation4 + $0x1] ss:$0 sm:$0xff] }
 0x606   :  { %1494 = vrsqrt.f32 %v444_v45  ;;  %v445_v47 = vadd.f32 1e-05, %v443_v46 }
 0x608   :  { %1496 = vrsqrt.f32 %v445_v47 }
 0x610   :  { %v1495_v52 = vpop.eup %1494 }
 0x611   :  { %v448_v54 = vmul.f32 %v1495_v52, %v432_v29 }
 0x612   :  { %v1497_v56 = vpop.eup %1496 }
 0x613   :  { %v449_v57 = vmul.f32 %v1497_v56, %v433_v31  ;;  %v454_v58 = vmul.f32 %v453_v51, %v448_v54 }
 0x615   :  { %v455_v59 = vmul.f32 %v453_v51, %v449_v57  ;;  %v460_v60 = vadd.f32 %v459_v55, %v454_v58  ;;  %v677_v57 = vrot.slane %v1797_v62, %v1764_v11 }
 0x617   :  { %v461_v61 = vadd.f32 %v459_v55, %v455_v59  ;;  %1365 = vmatprep.mubr.msk.f32.mxu0 %vm149_vm2, %v460_v60 }
 0x619   :  { %1366 = vmatmul.mubr.msk.f32.vlgmr.msra.gmra.mrb[8].mxu0 %vm149_vm2, %v461_v61 }
 0x61a   :  { %1372 = vmatprep.mubr.msk.bf16.mxu0 %vm1592_vm0, %v1591_v0  ;;  %1369 = vmatpush3.bf16.msra.mxu0 %v1478_v17  ;;  %v1241_v17 = vld [vmem:[%s1933_s3 + $0x48] sm:$0xff] }
 0x61b   :  { %1370 = vmatprep.subr.bf16.mxu0 %v1591_v0 }
 0x61e   :  { %1371 = vmatpush3.bf16.msra.mxu0 %v1479_v18 }
 0x6ec   :  { %v1367_v1 = vpop.f32.mrb[8].mxu0 }
 0x6ed   :  { %v551_v21 = vadd.f32 %v1367_v1, %v472_v63  ;;  %v545_v2 = vpop.f32.mrb[9].mxu0 }
 0x6ee   :  { %v546_v3 = vadd.f32 %v545_v2, %v472_v63 }
 0x6ef   :  { %v557_v4 = vsel %vm149_vm2, %v551_v21, 0.0 }
 0x6f0   :  { %558 = vadd.xlane.f32.xlu1 %v557_v4  ;;  %v554_v5 = vsel %vm149_vm2, %v546_v3, 0.0 }
 0x6f1   :  { %555 = vadd.xlane.f32.xlu0 %v554_v5 }
 0x77d   :  { %v559_v6 = vpop.xlane.xlu1 %558 }
 0x77e   :  { %v561_v7 = vmul.f32 0.03125, %v559_v6  ;;  %v556_v8 = vpop.xlane.xlu0 %555 }
 0x77f   :  { %v560_v9 = vmul.f32 0.03125, %v556_v8 }
 0x780   :  { %v563_v10 = vsub.f32 %v551_v21, %v561_v7 }
 0x781   :  { %v562_v12 = vsub.f32 %v546_v3, %v560_v9 }
 0x782   :  { %v565_v13 = vmul.f32 %v563_v10, %v563_v10 }
 0x783   :  { %v564_v14 = vmul.f32 %v562_v12, %v562_v12 }
 0x784   :  { %v569_v15 = vsel %vm149_vm2, %v565_v13, 0.0 }
 0x785   :  { %570 = vadd.xlane.f32.xlu1 %v569_v15  ;;  %v566_v16 = vsel %vm149_vm2, %v564_v14, 0.0 }
 0x786   :  { %567 = vadd.xlane.f32.xlu0 %v566_v16  ;;  %v1240_v16 = vld [vmem:[%s1933_s3 + $0x40] sm:$0xff] }
 0x787   :  { %v1446_v18 = vpack.c.bf16 %v1241_v17, %v1240_v16  ;;  %v1488_v17 = vld [vmem:[%s1936_s6 + $0x50] sm:$0xff]  }
 0x789   :  { %1447 = vmatprep.subr.bf16.mxu0 %v1446_v18 }
 0x812   :  { %v571_v24 = vpop.xlane.xlu1 %570 }
 0x813   :  { %v573_v25 = vmul.f32 0.03125, %v571_v24  ;;  %v568_v26 = vpop.xlane.xlu0 %567  ;;  %v1450_v24 = vpack.c.bf16 %v1243_v23, %v1242_v22 }
 0x814   :  { %v572_v27 = vmul.f32 0.03125, %v568_v26 }
 0x815   :  { %v575_v28 = vadd.f32 1e-05, %v573_v25 }
 0x816   :  { %v574_v29 = vadd.f32 1e-05, %v572_v27 }
 0x817   :  { %1498 = vrsqrt.f32 %v575_v28 }
 0x818   :  { %1500 = vrsqrt.f32 %v574_v29 }
 0x821   :  { %v1499_v31 = vpop.eup %1498 }
 0x822   :  { %v1501_v32 = vpop.eup %1500  ;;  %v579_v33 = vmul.f32 %v1499_v31, %v563_v10  ;;  %v777_v31 = vrot.slane %v1797_v62, %v452_v48  ;;  %v1865_v48 = vld [vmem:[#allocation6 + $0x10] sm:$0x3f] }
 0x823   :  { %v578_v35 = vmul.f32 %v1501_v32, %v562_v12  ;;  %v796_v19 = vrot.slane %v1865_v48, %v1716_v20 }
 0x824   :  { %v585_v36 = vmul.f32 %v583_v30, %v579_v33 }
 0x825   :  { %v584_v37 = vmul.f32 %v583_v30, %v578_v35 }
 0x826   :  { %v591_v38 = vadd.f32 %v589_v34, %v585_v36 }
 0x827   :  { %v590_v39 = vadd.f32 %v589_v34, %v584_v37  ;;  %v783_v34 = vrot.slane %v1797_v62, %v458_v50 }
 0x829   :  { %v597_v40 = vpack.c.bf16 %v591_v38, %v590_v39 }
 0x82b   :  { %1373 = vmatmul.mubr.msk.bf16.vlgmr.msra.gmra.mrb[12].mxu0 %vm149_vm2, %v597_v40 }
 0x82c   :  { %1449 = vmatpush3.bf16.msra.mxu0 %v1446_v18 }
 0x82d   :  { %1451 = vmatprep.subr.bf16.mxu0 %v1450_v24 }
 0x830   :  { %1453 = vmatpush3.bf16.msra.mxu0 %v1450_v24 }
 0x831   :  { %1399 = vmatprep.subr.bf16.mxu0 %v1591_v0 }
 0x8fe   :  { %v655_v44 = vpop.f32.mrb[12].mxu0 }
 0x8ff   :  { %v656_v45 = vadd.f32 %v1223_v43, %v655_v44  ;;  %v1374_v46 = vpop.f32.mrb[13].mxu0 }
 0x900   :  { %v658_v47 = vpop.f32.mrb[14].mxu0 }
 0x901   :  { %v659_v51 = vadd.f32 %v1223_v43, %v658_v47  ;;  %v1375_v52 = vpop.f32.mrb[15].mxu0  ;;  %v662_v54 = vmax.f32 %v656_v45, 0.0 }
 0x903   :  { %v663_v55 = vmax.f32 %v659_v51, 0.0 }
 0x905   :  { %v673_v56 = vpack.c.bf16 %v663_v55, %v662_v54 }
 0x907   :  { %1385 = vmatmul.mubr.msk.bf16.vlgmr.msra.gmra.mrb[8].mxu1 %vm377_vm3, %v673_v56 }
 0x908   :  { %1415 = vmatprep.mubr.msk.bf16.mxu1 %vm1592_vm0, %v1591_v0 }
 0x9da   :  { %v739_v58 = vpop.f32.mrb[8].mxu1 }
 0x9db   :  { %v740_v59 = vadd.f32 %v739_v58, %v677_v57  ;;  %v1386_v60 = vpop.f32.mrb[9].mxu1  ;;  %v1484_v58 = vld [vmem:[%s1934_s4 + $0x20] sm:$0xff]  }
 0x9dc   :  { %v742_v61 = vpop.f32.mrb[10].mxu1  ;;  %v1486_v60 = vld [vmem:[%s1936_s6 + $0x40] sm:$0xff]  }
 0x9dd   :  { %v743_v63 = vadd.f32 %v742_v61, %v677_v57  ;;  %v1387_v1 = vpop.f32.mrb[11].mxu1  ;;  %v746_v21 = vadd.f32 %v740_v59, %v590_v39  ;;  %v1485_v59 = vld [vmem:[%s1934_s4 + $0x28] sm:$0xff]   ;;  %1408 = vmatpush3.bf16.msra.mxu1 %v1486_v60 }
 0x9de   :  { %v1487_v61 = vld [vmem:[%s1936_s6 + $0x48] sm:$0xff]   ;;  %1409 = vmatprep.subr.bf16.mxu1 %v1591_v0 }
 0x9df   :  { %v748_v2 = vsel %vm149_vm2, %v746_v21, 0.0  ;;  %v747_v3 = vadd.f32 %v743_v63, %v591_v38 }
 0x9e0   :  { %749 = vadd.xlane.f32.xlu0 %v748_v2 }
 0x9e1   :  { %v751_v4 = vsel %vm149_vm2, %v747_v3, 0.0  ;;  %1410 = vmatpush3.bf16.msra.mxu1 %v1487_v61 }
 0x9e2   :  { %752 = vadd.xlane.f32.xlu1 %v751_v4  ;;  %1411 = vmatprep.subr.bf16.mxu1 %v1591_v0 }
 0x9e5   :  { %1412 = vmatpush3.bf16.msra.mxu1 %v1488_v17 }
 0x9e6   :  { %1413 = vmatprep.subr.bf16.mxu1 %v1591_v0 }
 0xa6d   :  { %v750_v5 = vpop.xlane.xlu0 %749 }
 0xa6e   :  { %v754_v6 = vmul.f32 0.03125, %v750_v5  ;;  %v907_v5 = vrot.slane %v1865_v48, %v1742_v49  ;;  %v1489_v49 = vld [vmem:[%s1936_s6 + $0x58] sm:$0xff]  }
 0xa6f   :  { %v753_v7 = vpop.xlane.xlu1 %752  ;;  %1414 = vmatpush3.bf16.msra.mxu1 %v1489_v49 }
 0xa70   :  { %v756_v8 = vsub.f32 %v746_v21, %v754_v6  ;;  %v755_v9 = vmul.f32 0.03125, %v753_v7 }
 0xa72   :  { %v757_v10 = vsub.f32 %v747_v3, %v755_v9  ;;  %v758_v12 = vmul.f32 %v756_v8, %v756_v8 }
 0xa74   :  { %v760_v13 = vsel %vm149_vm2, %v758_v12, 0.0  ;;  %v759_v14 = vmul.f32 %v757_v10, %v757_v10 }
 0xa75   :  { %761 = vadd.xlane.f32.xlu0 %v760_v13 }
 0xa76   :  { %v763_v15 = vsel %vm149_vm2, %v759_v14, 0.0 }
 0xa77   :  { %764 = vadd.xlane.f32.xlu1 %v763_v15 }
 0xb02   :  { %v762_v25 = vpop.xlane.xlu0 %761 }
 0xb03   :  { %v766_v26 = vmul.f32 0.03125, %v762_v25 }
 0xb04   :  { %v765_v27 = vpop.xlane.xlu1 %764 }
 0xb05   :  { %v768_v28 = vadd.f32 1e-05, %v766_v26  ;;  %v767_v29 = vmul.f32 0.03125, %v765_v27 }
 0xb07   :  { %1502 = vrsqrt.f32 %v768_v28  ;;  %v769_v30 = vadd.f32 1e-05, %v767_v29 }
 0xb09   :  { %1504 = vrsqrt.f32 %v769_v30 }
 0xb11   :  { %v1503_v32 = vpop.eup %1502 }
 0xb12   :  { %v772_v33 = vmul.f32 %v1503_v32, %v756_v8  ;;  %v913_v8 = vrot.slane %v1865_v48, %v1747_v53  ;;  %v1250_v53 = vld [vmem:[#allocation4 + $0x2] ss:$0 sm:$0xff] }
 0xb13   :  { %v1505_v35 = vpop.eup %1504 }
 0xb14   :  { %v773_v36 = vmul.f32 %v1505_v35, %v757_v10  ;;  %v778_v37 = vmul.f32 %v777_v31, %v772_v33 }
 0xb16   :  { %v779_v38 = vmul.f32 %v777_v31, %v773_v36  ;;  %v784_v39 = vadd.f32 %v783_v34, %v778_v37 }
 0xb18   :  { %v785_v40 = vadd.f32 %v783_v34, %v779_v38  ;;  %1396 = vmatprep.mubr.msk.f32.mxu0 %vm149_vm2, %v784_v39 }
 0xb1a   :  { %1397 = vmatmul.mubr.msk.f32.vlgmr.msra.gmra.mrb[10].mxu0 %vm149_vm2, %v785_v40 }
 0xb1b   :  { %1403 = vmatprep.mubr.msk.bf16.mxu0 %vm1592_vm0, %v1591_v0  ;;  %1400 = vmatpush3.bf16.msra.mxu0 %v1484_v58 }
 0xb1c   :  { %1401 = vmatprep.subr.bf16.mxu0 %v1591_v0  ;;  %v1001_v0 = vrot.slane %v1865_v48, %v1764_v11 }
 0xb1f   :  { %1402 = vmatpush3.bf16.msra.mxu0 %v1485_v59 }
 0xbed   :  { %v1398_v41 = vpop.f32.mrb[10].mxu0 }
 0xbee   :  { %v875_v50 = vadd.f32 %v1398_v41, %v796_v19  ;;  %v869_v62 = vpop.f32.mrb[11].mxu0 }
 0xbef   :  { %v870_v42 = vadd.f32 %v869_v62, %v796_v19 }
 0xbf0   :  { %v881_v43 = vsel %vm149_vm2, %v875_v50, 0.0 }
 0xbf1   :  { %882 = vadd.xlane.f32.xlu1 %v881_v43  ;;  %v878_v44 = vsel %vm149_vm2, %v870_v42, 0.0 }
 0xbf2   :  { %879 = vadd.xlane.f32.xlu0 %v878_v44 }
 0xc7e   :  { %v883_v45 = vpop.xlane.xlu1 %882 }
 0xc7f   :  { %v885_v46 = vmul.f32 0.03125, %v883_v45  ;;  %v880_v47 = vpop.xlane.xlu0 %879  ;;  %v1098_v45 = vld [vmem:[%s1938_s8] sm:$0xff] }
 0xc80   :  { %v884_v51 = vmul.f32 0.03125, %v880_v47 }
 0xc81   :  { %v887_v52 = vsub.f32 %v875_v50, %v885_v46  ;;  %v1099_v46 = vld [vmem:[%s1938_s8 + $0x8] sm:$0xff] }
 0xc82   :  { %v886_v54 = vsub.f32 %v870_v42, %v884_v51  ;;  %v1454_v47 = vpack.c.bf16 %v1099_v46, %v1098_v45  ;;  %v1100_v51 = vld [vmem:[%s1938_s8 + $0x10] sm:$0xff] }
 0xc83   :  { %v889_v55 = vmul.f32 %v887_v52, %v887_v52 }
 0xc84   :  { %v888_v56 = vmul.f32 %v886_v54, %v886_v54  ;;  %1455 = vmatprep.subr.bf16.mxu0 %v1454_v47 }
 0xc85   :  { %v893_v20 = vsel %vm149_vm2, %v889_v55, 0.0 }
 0xc86   :  { %894 = vadd.xlane.f32.xlu1 %v893_v20  ;;  %v890_v57 = vsel %vm149_vm2, %v888_v56, 0.0 }
 0xc87   :  { %891 = vadd.xlane.f32.xlu0 %v890_v57 }
 0xd13   :  { %v895_v63 = vpop.xlane.xlu1 %894 }
 0xd14   :  { %v897_v1 = vmul.f32 0.03125, %v895_v63  ;;  %v892_v21 = vpop.xlane.xlu0 %891 }
 0xd15   :  { %v896_v2 = vmul.f32 0.03125, %v892_v21  ;;  %v1267_v21 = vld [vmem:[%s1939_s9] ss:$0 sm:$0xff] }
 0xd16   :  { %v899_v3 = vadd.f32 1e-05, %v897_v1 }
 0xd17   :  { %v898_v4 = vadd.f32 1e-05, %v896_v2 }
 0xd18   :  { %1506 = vrsqrt.f32 %v899_v3 }
 0xd19   :  { %1508 = vrsqrt.f32 %v898_v4 }
 0xd22   :  { %v1507_v6 = vpop.eup %1506 }
 0xd23   :  { %v1509_v7 = vpop.eup %1508  ;;  %v903_v9 = vmul.f32 %v1507_v6, %v887_v52  ;;  %v1101_v52 = vld [vmem:[%s1938_s8 + $0x18] sm:$0xff] }
 0xd24   :  { %v902_v10 = vmul.f32 %v1509_v7, %v886_v54  ;;  %v1458_v54 = vpack.c.bf16 %v1101_v52, %v1100_v51 }
 0xd25   :  { %v909_v12 = vmul.f32 %v907_v5, %v903_v9 }
 0xd26   :  { %v908_v13 = vmul.f32 %v907_v5, %v902_v10 }
 0xd27   :  { %v915_v14 = vadd.f32 %v913_v8, %v909_v12 }
 0xd28   :  { %v914_v15 = vadd.f32 %v913_v8, %v908_v13 }
 0xd2a   :  { %v921_v16 = vpack.c.bf16 %v915_v14, %v914_v15 }
 0xd2c   :  { %1404 = vmatmul.mubr.msk.bf16.vlgmr.msra.gmra.mrb[16].mxu0 %vm149_vm2, %v921_v16 }
 0xd2d   :  { %1457 = vmatpush3.bf16.msra.mxu0 %v1454_v47 }
 0xd2e   :  { %1459 = vmatprep.subr.bf16.mxu0 %v1458_v54 }
 0xd31   :  { %1461 = vmatpush3.bf16.msra.mxu0 %v1458_v54 }
 0xdff   :  { %v979_v18 = vpop.f32.mrb[16].mxu0 }
 0xe00   :  { %v980_v22 = vadd.f32 %v1250_v53, %v979_v18  ;;  %v1405_v23 = vpop.f32.mrb[17].mxu0 }
 0xe01   :  { %v982_v24 = vpop.f32.mrb[18].mxu0 }
 0xe02   :  { %v983_v25 = vadd.f32 %v1250_v53, %v982_v24  ;;  %v1406_v26 = vpop.f32.mrb[19].mxu0  ;;  %v986_v27 = vmax.f32 %v980_v22, 0.0 }
 0xe04   :  { %v987_v28 = vmax.f32 %v983_v25, 0.0 }
 0xe06   :  { %v997_v29 = vpack.c.bf16 %v987_v28, %v986_v27 }
 0xe08   :  { %1416 = vmatmul.mubr.msk.bf16.vlgmr.msra.gmra.mrb[12].mxu1 %vm377_vm3, %v997_v29 }
 0xedb   :  { %v1063_v30 = vpop.f32.mrb[12].mxu1 }
 0xedc   :  { %v1064_v31 = vadd.f32 %v1063_v30, %v1001_v0  ;;  %v1417_v32 = vpop.f32.mrb[13].mxu1 }
 0xedd   :  { %v1066_v33 = vpop.f32.mrb[14].mxu1 }
 0xede   :  { %v1067_v34 = vadd.f32 %v1066_v33, %v1001_v0  ;;  %v1418_v35 = vpop.f32.mrb[15].mxu1  ;;  %v1070_v36 = vadd.f32 %v1064_v31, %v914_v15 }
 0xee0   :  { %v1072_v37 = vsel %vm149_vm2, %v1070_v36, 0.0  ;;  %v1071_v38 = vadd.f32 %v1067_v34, %v915_v14 }
 0xee1   :  { %1073 = vadd.xlane.f32.xlu0 %v1072_v37 }
 0xee2   :  { %v1075_v39 = vsel %vm149_vm2, %v1071_v38, 0.0 }
 0xee3   :  { %1076 = vadd.xlane.f32.xlu1 %v1075_v39 }
 0xf6e   :  { %v1074_v40 = vpop.xlane.xlu0 %1073 }
 0xf6f   :  { %v1078_v19 = vmul.f32 0.03125, %v1074_v40 }
 0xf70   :  { %v1077_v41 = vpop.xlane.xlu1 %1076 }
 0xf71   :  { %v1080_v50 = vsub.f32 %v1070_v36, %v1078_v19  ;;  %v1079_v62 = vmul.f32 0.03125, %v1077_v41 }
 0xf73   :  { %v1081_v11 = vsub.f32 %v1071_v38, %v1079_v62  ;;  %v1082_v48 = vmul.f32 %v1080_v50, %v1080_v50 }
 0xf75   :  { %v1084_v42 = vsel %vm149_vm2, %v1082_v48, 0.0  ;;  %v1083_v43 = vmul.f32 %v1081_v11, %v1081_v11 }
 0xf76   :  { %1085 = vadd.xlane.f32.xlu0 %v1084_v42 }
 0xf77   :  { %v1087_v44 = vsel %vm149_vm2, %v1083_v43, 0.0 }
 0xf78   :  { %1088 = vadd.xlane.f32.xlu1 %v1087_v44 }
0x1003   :  { %v1086_v55 = vpop.xlane.xlu0 %1085 }
0x1004   :  { %v1090_v56 = vmul.f32 0.03125, %v1086_v55 }
0x1005   :  { %v1089_v20 = vpop.xlane.xlu1 %1088 }
0x1006   :  { %v1092_v57 = vadd.f32 1e-05, %v1090_v56  ;;  %v1091_v58 = vmul.f32 0.03125, %v1089_v20 }
0x1008   :  { %1510 = vrsqrt.f32 %v1092_v57  ;;  %v1093_v59 = vadd.f32 1e-05, %v1091_v58 }
0x100a   :  { %1512 = vrsqrt.f32 %v1093_v59 }
0x1012   :  { %v1511_v60 = vpop.eup %1510 }
0x1013   :  { %v1096_v61 = vmul.f32 %v1511_v60, %v1080_v50 }
0x1014   :  { %v1513_v63 = vpop.eup %1512 }
0x1015   :  { %v1097_v1 = vmul.f32 %v1513_v63, %v1081_v11  ;;  %1427 = vmatprep.mubr.msk.f32.mxu0 %vm149_vm2, %v1096_v61 }
0x1017   :  { %1428 = vmatmul.mubr.msk.f32.vlgmr.msra.gmra.mrb[20].mxu0 %vm149_vm2, %v1097_v1 }
0x10ea   :  { %v1429_v2 = vpop.f32.mrb[20].mxu0 }
0x10eb   :  { %v1187_v3 = vadd.f32 %v1429_v2, %v1267_v21  ;;  %v1181_v4 = vpop.f32.mrb[21].mxu0 }
0x10ec   :  { %v1182_v5 = vadd.f32 %v1267_v21, %v1181_v4 }
0x10ed   :  { %1192 = vst.msk [vmem:[%s1940_s10 + $0x8] sm:$0xff] %vm1190_vm4, %v1187_v3 }
0x10ee   :  { %1191 = vst.msk [vmem:[%s1940_s10] sm:$0xff] %vm1190_vm4, %v1182_v5 }
0x10ef   :  { %1197 = vsyncpa [#allocation3], 1 }
0x10f0   :  { %1198 = vsyncpa [#allocation5], 1 }

</bundles_post_ra>
